<compile_context>
chip_gen: v5e
topology: v5e:2x2
jax: 0.10.0
libtpu: 0.0.40
codegen_flags: <defaults>
</compile_context>

<pallas_src>
from typing import NamedTuple

import numpy as np
import jax
import jax.numpy as jnp
from jax.experimental import pallas as pl
from jax.experimental.pallas import tpu as pltpu


# ----------------------------------------------------------------------------
# Parameter construction (mirrors torch __init__, done once in plain numpy).
# ----------------------------------------------------------------------------
def get_position_encoding(seq_len, d, n=10000):
    P = np.zeros((seq_len, d), dtype=np.float64)
    k = np.arange(seq_len, dtype=np.float64)[:, None]             # (seq_len, 1)
    i = np.arange(d // 2, dtype=np.float64)[None, :]               # (1, d/2)
    denom = np.power(float(n), 2.0 * i / d)
    P[:, 0::2] = np.sin(k / denom)
    P[:, 1::2] = np.cos(k / denom)
    return P


def build_positional_embedding(d_input, height, width):
    """(d_input, height, width) float32 buffer, matching the torch module's
    registered buffer (minus the leading unsqueeze(0) batch-broadcast dim)."""
    assert d_input >= 8, "module pads the channel dim by (d_input - 8) >= 0"
    pos = get_position_encoding(max(height, width), 4)             # (max(h,w), 4)
    horizontal = np.broadcast_to(pos[:width, :][:, None, :], (width, height, 4))
    vertical = np.broadcast_to(pos[:height, :][None, :, :], (width, height, 4))
    pe = np.concatenate([horizontal, vertical], axis=2)            # (W, H, 8)
    pe = np.pad(pe, ((0, 0), (0, 0), (0, d_input - 8)))            # (W, H, C)
    pe = np.transpose(pe, (2, 1, 0))                               # (C, H, W)
    return np.asarray(pe, dtype=np.float32)


# ----------------------------------------------------------------------------
# Build-time preparation (done ONCE, not per forward call).
# ----------------------------------------------------------------------------
class PEMeta(NamedTuple):
    lane_width: int        # last-dim width of the lane-dense view (mult of 128)
    r_blk: int             # rows per block
    num_chunks: int        # grid extent along the chunk (row) axis
    fast: bool             # True: bitcast view + sparsity + output aliasing
    vmem_limit_bytes: int


def prepare_position_encoding(d_input, height, width, *, dtype=jnp.float32,
                              target_block_bytes=4 * 1024 * 1024):
    """Returns (pe_rows, meta).

    pe_rows: (num_chunks * r_blk, lane_width) array already cast to `dtype`,
             holding the flattened pe over the rows the kernel will visit
             (zero-padded to the block multiple).
    meta:    static tiling info consumed by position_encoding_block_2d
             (hashable -> usable as a static jit argument).
    """
    C, H, W = int(d_input), int(height), int(width)
    pe = build_positional_embedding(C, H, W)                       # (C, H, W) f32
    N = C * H * W
    n_active = 8 * H * W            # pe[c] == 0 for all c >= 8

    itemsize = jnp.dtype(dtype).itemsize
    sub = max(8, 32 // itemsize)    # packed sublanes: 8 f32 / 16 bf16 / 32 int8

    lane_width = next((lw for lw in (512, 256, 128) if N % lw == 0), None)
    fast = lane_width is not None
    if not fast:
        # Ragged fallback: x is zero-padded per call (one extra HBM pass) and
        # the whole tensor is processed (no sparsity / aliasing).
        lane_width = 128

    # Rows the kernel must visit.
    r_cov = pl.cdiv(n_active if fast else N, lane_width)

    # Block rows: ~target_block_bytes per block, multiple of the sublane pack,
    # balanced across chunks.
    rows_target = max(sub, (target_block_bytes // (lane_width * itemsize)) // sub * sub)
    num_chunks = pl.cdiv(r_cov, rows_target)
    r_blk = pl.cdiv(pl.cdiv(r_cov, num_chunks), sub) * sub
    if fast and num_chunks == 1 and r_blk > N // lane_width:
        # Block may not exceed the array extent unless it equals it exactly.
        r_blk = N // lane_width

    # pe preprocessing happens HERE, once: cast to the compute dtype (torch
    # also casts pe to x.dtype *before* the add), flatten, zero-pad up to the
    # covered block multiple.
    needed = num_chunks * r_blk * lane_width
    flat = np.zeros((needed,), dtype=np.float32)
    take = min(needed, N)
    flat[:take] = pe.reshape(-1)[:take]
    pe_rows = jnp.asarray(flat.reshape(num_chunks * r_blk, lane_width), dtype=dtype)

    # x, pe and out blocks are each double-buffered -> ~6x the block size live.
    block_bytes = r_blk * lane_width * itemsize
    vmem_limit = int(min(max(32 * 2**20, 6 * block_bytes + 4 * 2**20), 56 * 2**20))

    meta = PEMeta(lane_width=lane_width, r_blk=r_blk, num_chunks=num_chunks,
                  fast=fast, vmem_limit_bytes=vmem_limit)
    return pe_rows, meta


# ----------------------------------------------------------------------------
# Pallas kernel: lane-dense broadcast add (purely HBM-bandwidth bound).
#   x_ref : (1, r_blk, lane_width) block of one batch element
#   pe_ref: (r_blk, lane_width) block (shared across the batch loop)
# ----------------------------------------------------------------------------
def _pos_add_kernel(x_ref, pe_ref, o_ref):
    o_ref[...] = x_ref[...] + pe_ref[...]


def position_encoding_block_2d(x, pe_rows, meta: PEMeta):
    """out[b, c, h, w] = x[b, c, h, w] + pe[c, h, w]   (pe[c >= 8] == 0)

    x: (B, C, H, W); (pe_rows, meta) from prepare_position_encoding(C, H, W).
    For best performance jit with donate_argnums=(0,) so the untouched
    channels >= 8 pass through via buffer aliasing at zero HBM cost.
    """
    B, C, H, W = x.shape
    N = C * H * W
    lw, r_blk, num_chunks = meta.lane_width, meta.r_blk, meta.num_chunks

    if pe_rows.dtype != x.dtype:
        # Slow path; prefer prepare_position_encoding(..., dtype=x.dtype).
        pe_rows = pe_rows.astype(x.dtype)

    # Megacore: split on chunks (pe fetched once per core); if there is only a
    # single chunk, let batch split instead so both TensorCores get work.
    dims = ("parallel", "arbitrary") if num_chunks >= 2 else ("parallel", "parallel")
    cparams = pltpu.CompilerParams(dimension_semantics=dims,
                                   vmem_limit_bytes=meta.vmem_limit_bytes)

    x_spec = pl.BlockSpec((1, r_blk, lw), lambda c, b: (b, c, 0))
    pe_spec = pl.BlockSpec((r_blk, lw), lambda c, b: (c, 0))
    out_spec = pl.BlockSpec((1, r_blk, lw), lambda c, b: (b, c, 0))

    if meta.fast:
        # Lane-dense bitcast view; no pad, no copy, no output slice.
        r_total = N // lw
        x3 = x.reshape(B, r_total, lw)
        out = pl.pallas_call(
            _pos_add_kernel,
            out_shape=jax.ShapeDtypeStruct((B, r_total, lw), x.dtype),
            grid=(num_chunks, B),        # batch innermost: pe reused across it
            in_specs=[x_spec, pe_spec],
            out_specs=out_spec,
            # Alias x -> out: rows beyond the 8 nonzero pe channels are never
            # visited by the grid, so they pass through untouched.
            input_output_aliases={0: 0},
            compiler_params=cparams,
        )(x3, pe_rows)
        return out.reshape(B, C, H, W)

    # ---- Ragged fallback (C*H*W % 128 != 0): pad x per call, process all.
    # TODO(synk): this path pays one extra HBM pass for the pad + slice.
    r_pad = num_chunks * r_blk
    n_pad = r_pad * lw
    x3 = jnp.pad(x.reshape(B, N), ((0, 0), (0, n_pad - N))).reshape(B, r_pad, lw)
    out = pl.pallas_call(
        _pos_add_kernel,
        out_shape=jax.ShapeDtypeStruct((B, r_pad, lw), x.dtype),
        grid=(num_chunks, B),
        in_specs=[x_spec, pe_spec],
        out_specs=out_spec,
        compiler_params=cparams,
    )(x3, pe_rows)
    return out.reshape(B, n_pad)[:, :N].reshape(B, C, H, W)


# ----------------------------------------------------------------------------
# Self-test
# ----------------------------------------------------------------------------
def _check(B, C, H, W, dtype=jnp.float32, seed=0):
    pe_rows, meta = prepare_position_encoding(C, H, W, dtype=dtype)
    donate = (0,) if meta.fast else ()       # aliasing only used on fast path
    fwd = jax.jit(position_encoding_block_2d, static_argnums=(2,),
                  donate_argnums=donate)

    x = jax.random.normal(jax.random.PRNGKey(seed), (B, C, H, W), dtype=dtype)
    pe_full = build_positional_embedding(C, H, W)
    # Reference matches torch: pe cast to x.dtype, then added.
    ref = x + jnp.asarray(pe_full, dtype=dtype)[None]

    out = jax.block_until_ready(fwd(x, pe_rows, meta))
    assert out.shape == (B, C, H, W) and out.dtype == jnp.dtype(dtype)
    np.testing.assert_allclose(np.asarray(out), np.asarray(ref),
                               rtol=1e-6, atol=1e-6)


if __name__ == "__main__":
    # Fast path: C*H*W % 512 == 0; only channels < 8 touched, rest aliased.
    _check(2, 16, 16, 16)
    # Fast path where the last visited row straddles into the zero channels
    # and a trailing row is carried through untouched by the alias.
    _check(2, 16, 12, 12)
    # Ragged fallback path: C*H*W % 128 != 0 (pad + full processing).
    _check(2, 12, 10, 10)
    print("KERNEL_OK")
</pallas_src>

<mosaic_0001>
module attributes {stable_mosaic.version = 11 : i64} {
  func.func @_pos_add_kernel(%arg0: i32, %arg1: i32, %arg2: memref<1x8x512xf32, #tpu.memory_space<vmem>>, %arg3: memref<8x512xf32, #tpu.memory_space<vmem>>, %arg4: memref<1x8x512xf32, #tpu.memory_space<vmem>>) attributes {dimension_semantics = [#tpu.dimension_semantics<parallel>, #tpu.dimension_semantics<parallel>], iteration_bounds = array<i64: 1, 2>, scalar_prefetch = 0 : i64, scratch_operands = 0 : i64, tpu.core_type = #tpu.core_type<tc>, window_params = [{transform_indices = @transform_0, window_bounds = array<i64: 1, 8, 512>}, {transform_indices = @transform_1, window_bounds = array<i64: 8, 512>}, {transform_indices = @transform_2, window_bounds = array<i64: 1, 8, 512>}]} {
    %c0 = arith.constant 0 : index
    %c0_0 = arith.constant 0 : index
    %c0_1 = arith.constant 0 : index
    %0 = vector.load %arg2[%c0, %c0_0, %c0_1] : memref<1x8x512xf32, #tpu.memory_space<vmem>>, vector<1x8x512xf32>
    %c0_2 = arith.constant 0 : index
    %c0_3 = arith.constant 0 : index
    %1 = vector.load %arg3[%c0_2, %c0_3] : memref<8x512xf32, #tpu.memory_space<vmem>>, vector<8x512xf32>
    %2 = vector.shape_cast %1 : vector<8x512xf32> to vector<1x8x512xf32>
    %3 = arith.addf %0, %2 : vector<1x8x512xf32>
    %c0_4 = arith.constant 0 : index
    %c0_5 = arith.constant 0 : index
    %c0_6 = arith.constant 0 : index
    %4 = vector.load %arg4[%c0_4, %c0_5, %c0_6] : memref<1x8x512xf32, #tpu.memory_space<vmem>>, vector<1x8x512xf32>
    tpu.vector_store %arg4[%c0_4, %c0_5, %c0_6], %3 {strides = array<i32>} : memref<1x8x512xf32, #tpu.memory_space<vmem>>, vector<1x8x512xf32>,
    return
  }
  func.func @transform_0(%arg0: i32, %arg1: i32) -> (i32, i32, i32) {
    %c0_i32 = arith.constant 0 : i32
    %c0_i32_0 = arith.constant 0 : i32
    return %arg1, %arg0, %c0_i32 : i32, i32, i32
  }
  func.func @transform_1(%arg0: i32, %arg1: i32) -> (i32, i32) {
    %c0_i32 = arith.constant 0 : i32
    %c0_i32_0 = arith.constant 0 : i32
    return %arg0, %c0_i32 : i32, i32
  }
  func.func @transform_2(%arg0: i32, %arg1: i32) -> (i32, i32, i32) {
    %c0_i32 = arith.constant 0 : i32
    %c0_i32_0 = arith.constant 0 : i32
    return %arg1, %arg0, %c0_i32 : i32, i32, i32
  }
}

</mosaic_0001>

<bundles_post_ra>
// kernel: position_encoding_block_2d.1
= control target key start
LH: loop header
LB: loop body
LE: loop exit
PB: predicated region body
PF: predicated region fallthrough
CT: control target
= control target key end

     0   :  { %s401_s9 = smov 0   ;;  %s403_s10 = smov 0   ;;  %s443_s0 = inlined_call_operand.vmem [shape: f32[2,8,512], index: 0, kind: input, shape index: {}, may-alias: {0,2}]   ;;  %s444_s1 = inlined_call_operand.vmem [shape: f32[8,512], index: 1, kind: input, shape index: {}]   ;;  %s445_s2 = inlined_call_operand.vmem [shape: f32[2,8,512], index: 2, kind: output, shape index: {}, may-alias: {0,2}]  }
   0x1   :  { %s405_s11 = smov 0  }
   0x2 LB: > { %s21_s12 = sadd.s32 1, %s380_s10  ;;  %p329_p0 = scmp.ge.s32.totalorder %s384_s11, 1  ;;  %s384_s11 = sphi %s405_s11, %s12_s11   ;;  %s380_s10 = sphi %s403_s10, %s447_s10   ;;  %s376_s9 = sphi %s401_s9, %s446_s9  }
   0x3   : > { %p22_p1 = scmp.ge.s32.totalorder %s21_s12, 2  ;;  %p142_p2 = scmp.lt.s32.totalorder %s384_s11, 3 }
   0x5   : > { %s449_s12 = smov (%p22_p1, %s21_s12), 0  ;;  %p143_p3 = pnand %p329_p0, %p142_p2 }
   0x6   : > { %p177_p4 = scmp.lt.s32.totalorder (!%p143_p3), %s376_s9, 1 }
   0x7   : > { %146 = sbr.rel (%p143_p3) target bundleno = 22 (0x16), region = 28 }
   0xc   : > { %s451_s9 = smov (!%p177_p4, %s376_s9), 1  ;;  %v204_v0 = vld [vmem:[%s444_s1] sm:$0xff]  ;;  %v205_v1 = vld [vmem:[%s444_s1 + $0x8] sm:$0xff]  ;;  %v206_v2 = vld [vmem:[%s444_s1 + $0x10] sm:$0xff] }
   0xd   : > { %s336_s13 = sshll.u32 %s451_s9, 5  ;;  %v207_v3 = vld [vmem:[%s444_s1 + $0x18] sm:$0xff] }
   0xe   : > { %s185_s22 = scalar_lea.vmem %s443_s0, %s336_s13  ;;  %s199_s27 = scalar_lea.vmem %s445_s2, %s336_s13 }
   0xf   : > { %v200_v4 = vld [vmem:[%s185_s22] sm:$0xff]  ;;  %v201_v5 = vld [vmem:[%s185_s22 + $0x8] sm:$0xff]  ;;  %v202_v6 = vld [vmem:[%s185_s22 + $0x10] sm:$0xff] }
  0x10   : > { %v203_v7 = vld [vmem:[%s185_s22 + $0x18] sm:$0xff]  ;;  %v208_v8 = vadd.f32 %v204_v0, %v200_v4  ;;  %v209_v9 = vadd.f32 %v205_v1, %v201_v5  ;;  %v210_v10 = vadd.f32 %v206_v2, %v202_v6 }
  0x11   : > { %v211_v11 = vadd.f32 %v207_v3, %v203_v7 }
  0x12   : > { %212 = vst [vmem:[%s199_s27] sm:$0xff] %v208_v8 }
  0x13   : > { %213 = vst [vmem:[%s199_s27 + $0x8] sm:$0xff] %v209_v9 }
  0x14   : > { %214 = vst [vmem:[%s199_s27 + $0x10] sm:$0xff] %v210_v10 }
  0x15   : > { %215 = vst [vmem:[%s199_s27 + $0x18] sm:$0xff] %v211_v11 }
  0x16 PF: > { %s12_s11 = sadd.s32 1, %s384_s11   ;;  %s446_s9 = smov %s380_s10 }
  0x17   : > { %p9_p5 = scmp.ge.s32.totalorder %s12_s11, 4   ;;  %s447_s10 = smov %s449_s12 }
  0x19   :  { %11 = sbr.rel (!%p9_p5) target bundleno = 2 (0x2), region = 61 }

</bundles_post_ra>
